<compile_context>
chip_gen: v7x
topology: tpu7x:2x2x1
jax: 0.10.0
libtpu: 0.0.40
codegen_flags: <defaults>
</compile_context>

<pallas_src>
import functools

import jax
import jax.numpy as jnp
from jax import lax
from jax.experimental import pallas as pl
from jax.experimental.pallas import tpu as pltpu


def _fused_rnn_kernel(prev_emb_ref, emb_ref, h0h_ref,
                      whh_e_ref, whh_h_ref, bhh_ref,
                      who_e_ref, who_h_ref, bho_ref,
                      lp_ref, hid_ref, *, T, B):
    """Whole-sequence recurrence in one program.

    prev_emb_ref: (T*B, H2)  "previous embedded" feeding hidden_to_hidden at
                  step t (row t*B+b = embedded[t-1, b]; rows 0..B-1 = h0_e).
    emb_ref:      (T*B, H2)  embedded input at step t (feeds the output head).
    h0h_ref:      (B, H2)    second half of the initial hidden state.
    whh_*/who_*:  torch Linear weights pre-transposed and pre-split over the
                  [embedded | hidden_new] halves of hidden_cat (no in-kernel concat).
    Outputs: lp_ref (T*B, 2) per-step log-probs, hid_ref (T*B, H2) per-step hidden_new.
    """
    # --- Hoisted, batched precompute: contribution of the previous embedded
    # half to hidden_new for ALL steps, one (T*B,H2)x(H2,H2) MXU pass + bias.
    pre_hh = (jnp.dot(prev_emb_ref[...], whh_e_ref[...],
                      preferred_element_type=jnp.float32)
              + bhh_ref[...])                                    # (T*B, H2)

    whh_h = whh_h_ref[...]                                       # (H2, H2), vreg-resident

    # --- Serial recurrence: only the carry-critical dot remains per step.
    # Fully unrolled (T static) with static slice offsets so the non-carry
    # stores overlap the next step's matmul (equivalent to fori_loop unroll=True).
    prev_hid = h0h_ref[...]                                      # (B, H2)
    for t in range(T):
        hid_t = (jnp.dot(prev_hid, whh_h,
                         preferred_element_type=jnp.float32)
                 + pre_hh[t * B:(t + 1) * B, :])                 # (B, H2)
        hid_ref[t * B:(t + 1) * B, :] = hid_t                    # static-offset store
        prev_hid = hid_t

    # --- Hoisted output head for all steps: two batched matmuls + stable
    # log-softmax, computed once after the loop (off the serial chain).
    hid_all = hid_ref[...]                                       # (T*B, H2)
    logits = (jnp.dot(emb_ref[...], who_e_ref[...],
                      preferred_element_type=jnp.float32)
              + jnp.dot(hid_all, who_h_ref[...],
                        preferred_element_type=jnp.float32)
              + bho_ref[...])                                    # (T*B, 2)
    m = jnp.max(logits, axis=1, keepdims=True)
    lse = m + jnp.log(jnp.sum(jnp.exp(logits - m), axis=1, keepdims=True))
    lp_ref[...] = logits - lse


def meaning_classifier_sequence_forward(idx_seq, hidden0, emb_w, w_hh, b_hh, w_ho, b_ho):
    """Fused MeaningClassifier recurrence over a whole character sequence.

    idx_seq: (T, B) int32 character indices.
    hidden0: (B, H) f32 initial hidden state (the module uses zeros).
    emb_w:   (A, H//2) embedding table.
    w_hh:    (H//2, H) torch Linear weight (out, in);  b_hh: (H//2,).
    w_ho:    (2, H)    torch Linear weight (out, in);  b_ho: (2,).

    Returns (log_probs_seq (T, B, 2), hidden_seq (T, B, H)) where index t holds
    exactly what the PyTorch module's forward returns at recurrence step t.
    """
    T, B = idx_seq.shape
    H = hidden0.shape[1]
    H2 = H // 2
    meanings = w_ho.shape[0]

    # Embedding gather in the wrapper (cheap XLA gather), flattened time-major.
    embedded = emb_w[idx_seq.reshape(-1).astype(jnp.int32)]       # (T*B, H2)

    # "Previous embedded" sequence feeding hidden_to_hidden at step t:
    # step 0 sees the first half of hidden0, step t sees embedded[t-1].
    prev_emb = jnp.concatenate(
        [hidden0[:, :H2], embedded[:(T - 1) * B]], axis=0)        # (T*B, H2)
    h0_h = hidden0[:, H2:]                                        # (B, H2)

    # Pre-transpose for the x @ W.T convention and pre-split the H input dim
    # into the [embedded | hidden_new] halves so the kernel never concatenates.
    w_hh_t = w_hh.T                                               # (H, H/2)
    w_ho_t = w_ho.T                                               # (H, 2)
    whh_e, whh_h = w_hh_t[:H2], w_hh_t[H2:]
    who_e, who_h = w_ho_t[:H2], w_ho_t[H2:]
    b_hh_row = b_hh.reshape(1, H2)
    b_ho_row = b_ho.reshape(1, meanings)

    vmem = pl.BlockSpec(memory_space=pltpu.MemorySpace.VMEM)

    out_shapes = (
        jax.ShapeDtypeStruct((T * B, meanings), jnp.float32),     # per-step log-probs
        jax.ShapeDtypeStruct((T * B, H2), jnp.float32),           # per-step hidden_new half
    )
    lp_flat, hidnew_flat = pl.pallas_call(
        functools.partial(_fused_rnn_kernel, T=T, B=B),
        out_shape=out_shapes,
        in_specs=[vmem] * 9,
        out_specs=(vmem, vmem),
    )(prev_emb, embedded, h0_h,
      whh_e, whh_h, b_hh_row, who_e, who_h, b_ho_row)

    # Wrapper-side layout plumbing only: reshape to (T, B, ...) and present
    # hidden_cat exactly as the module does.
    lp_seq = lp_flat.reshape(T, B, meanings)
    hidnew_seq = hidnew_flat.reshape(T, B, H2)
    hidden_seq = jnp.concatenate([embedded.reshape(T, B, H2), hidnew_seq], axis=-1)
    return lp_seq, hidden_seq


def _reference_sequence(idx_seq, hidden0, emb_w, w_hh, b_hh, w_ho, b_ho):
    """Pure-JAX mirror of the PyTorch module applied step-by-step."""
    def step(hidden, idx_t):
        embedded = emb_w[idx_t]                                   # (B, H/2)
        hidden_new = hidden @ w_hh.T + b_hh                       # (B, H/2)
        hidden_cat = jnp.concatenate([embedded, hidden_new], axis=1)
        logits = hidden_cat @ w_ho.T + b_ho
        lp = logits - jax.scipy.special.logsumexp(logits, axis=1, keepdims=True)
        return hidden_cat, (lp, hidden_cat)

    _, (lp_seq, hid_seq) = lax.scan(step, hidden0, idx_seq)
    return lp_seq, hid_seq


if __name__ == "__main__":
    T = 16           # sequence length (characters)
    B = 8            # batch of independent sequences (fills a sublane group)
    H = 32           # hidden_size
    H2 = H // 2
    A = 26           # alphabet size (e.g. lowercase letters)
    MEANINGS = 2

    key = jax.random.PRNGKey(0)
    k_emb, k_whh, k_bhh, k_who, k_bho, k_idx, k_hid = jax.random.split(key, 7)

    # Deterministic synthetic parameters (shapes from the module __init__).
    emb_w = jax.random.normal(k_emb, (A, H2), dtype=jnp.float32)
    w_hh = jax.random.normal(k_whh, (H2, H), dtype=jnp.float32) * 0.1   # torch Linear: (out, in)
    b_hh = jax.random.normal(k_bhh, (H2,), dtype=jnp.float32) * 0.1
    w_ho = jax.random.normal(k_who, (MEANINGS, H), dtype=jnp.float32) * 0.1
    b_ho = jax.random.normal(k_bho, (MEANINGS,), dtype=jnp.float32) * 0.1

    # Example inputs: a (T, B) batch of character-index sequences + initial
    # hidden state (zeros in get_starting_hidden; randomized here to exercise
    # the hidden_to_hidden path as well).
    idx_seq = jax.random.randint(k_idx, (T, B), 0, A, dtype=jnp.int32)
    hidden0 = jax.random.normal(k_hid, (B, H), dtype=jnp.float32)

    lp_seq, hid_seq = meaning_classifier_sequence_forward(
        idx_seq, hidden0, emb_w, w_hh, b_hh, w_ho, b_ho)
    jax.block_until_ready((lp_seq, hid_seq))

    ref_lp, ref_hid = _reference_sequence(idx_seq, hidden0, emb_w, w_hh, b_hh, w_ho, b_ho)

    assert lp_seq.shape == (T, B, MEANINGS)
    assert hid_seq.shape == (T, B, H)
    assert jnp.allclose(lp_seq, ref_lp, atol=1e-4, rtol=1e-4)
    assert jnp.allclose(hid_seq, ref_hid, atol=1e-4, rtol=1e-4)

    print("KERNEL_OK")
</pallas_src>

<mosaic_0001>
module attributes {stable_mosaic.version = 11 : i64} {
  func.func @_fused_rnn_kernel(%arg0: memref<128x16xf32, #tpu.memory_space<vmem>>, %arg1: memref<128x16xf32, #tpu.memory_space<vmem>>, %arg2: memref<8x16xf32, #tpu.memory_space<vmem>>, %arg3: memref<16x16xf32, #tpu.memory_space<vmem>>, %arg4: memref<16x16xf32, #tpu.memory_space<vmem>>, %arg5: memref<1x16xf32, #tpu.memory_space<vmem>>, %arg6: memref<16x2xf32, #tpu.memory_space<vmem>>, %arg7: memref<16x2xf32, #tpu.memory_space<vmem>>, %arg8: memref<1x2xf32, #tpu.memory_space<vmem>>, %arg9: memref<128x2xf32, #tpu.memory_space<vmem>>, %arg10: memref<128x16xf32, #tpu.memory_space<vmem>>) attributes {dimension_semantics = [], scalar_prefetch = 0 : i64, scratch_operands = 0 : i64, tpu.core_type = #tpu.core_type<tc>} {
    %c0 = arith.constant 0 : index
    %c0_0 = arith.constant 0 : index
    %0 = vector.load %arg0[%c0, %c0_0] : memref<128x16xf32, #tpu.memory_space<vmem>>, vector<128x16xf32>
    %c0_1 = arith.constant 0 : index
    %c0_2 = arith.constant 0 : index
    %1 = vector.load %arg3[%c0_1, %c0_2] : memref<16x16xf32, #tpu.memory_space<vmem>>, vector<16x16xf32>
    %cst = arith.constant dense<0.000000e+00> : vector<128x16xf32>
    %2 = tpu.matmul %0, %1, %cst {dimension_numbers = #tpu.dot_dimension_numbers<[1], [0], [0], [1], [0, 0, 1, 1], [], []>} : vector<128x16xf32>, vector<16x16xf32>, vector<128x16xf32> -> vector<128x16xf32>
    %c0_3 = arith.constant 0 : index
    %c0_4 = arith.constant 0 : index
    %3 = vector.load %arg5[%c0_3, %c0_4] : memref<1x16xf32, #tpu.memory_space<vmem>>, vector<1x16xf32>
    %4 = vector.broadcast %3 : vector<1x16xf32> to vector<128x16xf32>
    %5 = arith.addf %2, %4 : vector<128x16xf32>
    %c0_5 = arith.constant 0 : index
    %c0_6 = arith.constant 0 : index
    %6 = vector.load %arg4[%c0_5, %c0_6] : memref<16x16xf32, #tpu.memory_space<vmem>>, vector<16x16xf32>
    %c0_7 = arith.constant 0 : index
    %c0_8 = arith.constant 0 : index
    %7 = vector.load %arg2[%c0_7, %c0_8] : memref<8x16xf32, #tpu.memory_space<vmem>>, vector<8x16xf32>
    %cst_9 = arith.constant dense<0.000000e+00> : vector<8x16xf32>
    %8 = tpu.matmul %7, %6, %cst_9 {dimension_numbers = #tpu.dot_dimension_numbers<[1], [0], [0], [1], [0, 0, 1, 1], [], []>} : vector<8x16xf32>, vector<16x16xf32>, vector<8x16xf32> -> vector<8x16xf32>
    %9 = vector.extract_strided_slice %5 {offsets = [0, 0], sizes = [8, 16], strides = [1, 1]} : vector<128x16xf32> to vector<8x16xf32>
    %10 = arith.addf %8, %9 : vector<8x16xf32>
    %c0_10 = arith.constant 0 : index
    %c0_11 = arith.constant 0 : index
    %11 = vector.load %arg10[%c0_10, %c0_11] : memref<128x16xf32, #tpu.memory_space<vmem>>, vector<8x16xf32>
    tpu.vector_store %arg10[%c0_10, %c0_11], %10 {strides = array<i32>} : memref<128x16xf32, #tpu.memory_space<vmem>>, vector<8x16xf32>,
    %cst_12 = arith.constant dense<0.000000e+00> : vector<8x16xf32>
    %12 = tpu.matmul %10, %6, %cst_12 {dimension_numbers = #tpu.dot_dimension_numbers<[1], [0], [0], [1], [0, 0, 1, 1], [], []>} : vector<8x16xf32>, vector<16x16xf32>, vector<8x16xf32> -> vector<8x16xf32>
    %13 = vector.extract_strided_slice %5 {offsets = [8, 0], sizes = [8, 16], strides = [1, 1]} : vector<128x16xf32> to vector<8x16xf32>
    %14 = arith.addf %12, %13 : vector<8x16xf32>
    %c8 = arith.constant 8 : index
    %c0_13 = arith.constant 0 : index
    %15 = vector.load %arg10[%c8, %c0_13] : memref<128x16xf32, #tpu.memory_space<vmem>>, vector<8x16xf32>
    tpu.vector_store %arg10[%c8, %c0_13], %14 {strides = array<i32>} : memref<128x16xf32, #tpu.memory_space<vmem>>, vector<8x16xf32>,
    %cst_14 = arith.constant dense<0.000000e+00> : vector<8x16xf32>
    %16 = tpu.matmul %14, %6, %cst_14 {dimension_numbers = #tpu.dot_dimension_numbers<[1], [0], [0], [1], [0, 0, 1, 1], [], []>} : vector<8x16xf32>, vector<16x16xf32>, vector<8x16xf32> -> vector<8x16xf32>
    %17 = vector.extract_strided_slice %5 {offsets = [16, 0], sizes = [8, 16], strides = [1, 1]} : vector<128x16xf32> to vector<8x16xf32>
    %18 = arith.addf %16, %17 : vector<8x16xf32>
    %c16 = arith.constant 16 : index
    %c0_15 = arith.constant 0 : index
    %19 = vector.load %arg10[%c16, %c0_15] : memref<128x16xf32, #tpu.memory_space<vmem>>, vector<8x16xf32>
    tpu.vector_store %arg10[%c16, %c0_15], %18 {strides = array<i32>} : memref<128x16xf32, #tpu.memory_space<vmem>>, vector<8x16xf32>,
    %cst_16 = arith.constant dense<0.000000e+00> : vector<8x16xf32>
    %20 = tpu.matmul %18, %6, %cst_16 {dimension_numbers = #tpu.dot_dimension_numbers<[1], [0], [0], [1], [0, 0, 1, 1], [], []>} : vector<8x16xf32>, vector<16x16xf32>, vector<8x16xf32> -> vector<8x16xf32>
    %21 = vector.extract_strided_slice %5 {offsets = [24, 0], sizes = [8, 16], strides = [1, 1]} : vector<128x16xf32> to vector<8x16xf32>
    %22 = arith.addf %20, %21 : vector<8x16xf32>
    %c24 = arith.constant 24 : index
    %c0_17 = arith.constant 0 : index
    %23 = vector.load %arg10[%c24, %c0_17] : memref<128x16xf32, #tpu.memory_space<vmem>>, vector<8x16xf32>
    tpu.vector_store %arg10[%c24, %c0_17], %22 {strides = array<i32>} : memref<128x16xf32, #tpu.memory_space<vmem>>, vector<8x16xf32>,
    %cst_18 = arith.constant dense<0.000000e+00> : vector<8x16xf32>
    %24 = tpu.matmul %22, %6, %cst_18 {dimension_numbers = #tpu.dot_dimension_numbers<[1], [0], [0], [1], [0, 0, 1, 1], [], []>} : vector<8x16xf32>, vector<16x16xf32>, vector<8x16xf32> -> vector<8x16xf32>
    %25 = vector.extract_strided_slice %5 {offsets = [32, 0], sizes = [8, 16], strides = [1, 1]} : vector<128x16xf32> to vector<8x16xf32>
    %26 = arith.addf %24, %25 : vector<8x16xf32>
    %c32 = arith.constant 32 : index
    %c0_19 = arith.constant 0 : index
    %27 = vector.load %arg10[%c32, %c0_19] : memref<128x16xf32, #tpu.memory_space<vmem>>, vector<8x16xf32>
    tpu.vector_store %arg10[%c32, %c0_19], %26 {strides = array<i32>} : memref<128x16xf32, #tpu.memory_space<vmem>>, vector<8x16xf32>,
    %cst_20 = arith.constant dense<0.000000e+00> : vector<8x16xf32>
    %28 = tpu.matmul %26, %6, %cst_20 {dimension_numbers = #tpu.dot_dimension_numbers<[1], [0], [0], [1], [0, 0, 1, 1], [], []>} : vector<8x16xf32>, vector<16x16xf32>, vector<8x16xf32> -> vector<8x16xf32>
    %29 = vector.extract_strided_slice %5 {offsets = [40, 0], sizes = [8, 16], strides = [1, 1]} : vector<128x16xf32> to vector<8x16xf32>
    %30 = arith.addf %28, %29 : vector<8x16xf32>
    %c40 = arith.constant 40 : index
    %c0_21 = arith.constant 0 : index
    %31 = vector.load %arg10[%c40, %c0_21] : memref<128x16xf32, #tpu.memory_space<vmem>>, vector<8x16xf32>
    tpu.vector_store %arg10[%c40, %c0_21], %30 {strides = array<i32>} : memref<128x16xf32, #tpu.memory_space<vmem>>, vector<8x16xf32>,
    %cst_22 = arith.constant dense<0.000000e+00> : vector<8x16xf32>
    %32 = tpu.matmul %30, %6, %cst_22 {dimension_numbers = #tpu.dot_dimension_numbers<[1], [0], [0], [1], [0, 0, 1, 1], [], []>} : vector<8x16xf32>, vector<16x16xf32>, vector<8x16xf32> -> vector<8x16xf32>
    %33 = vector.extract_strided_slice %5 {offsets = [48, 0], sizes = [8, 16], strides = [1, 1]} : vector<128x16xf32> to vector<8x16xf32>
    %34 = arith.addf %32, %33 : vector<8x16xf32>
    %c48 = arith.constant 48 : index
    %c0_23 = arith.constant 0 : index
    %35 = vector.load %arg10[%c48, %c0_23] : memref<128x16xf32, #tpu.memory_space<vmem>>, vector<8x16xf32>
    tpu.vector_store %arg10[%c48, %c0_23], %34 {strides = array<i32>} : memref<128x16xf32, #tpu.memory_space<vmem>>, vector<8x16xf32>,
    %cst_24 = arith.constant dense<0.000000e+00> : vector<8x16xf32>
    %36 = tpu.matmul %34, %6, %cst_24 {dimension_numbers = #tpu.dot_dimension_numbers<[1], [0], [0], [1], [0, 0, 1, 1], [], []>} : vector<8x16xf32>, vector<16x16xf32>, vector<8x16xf32> -> vector<8x16xf32>
    %37 = vector.extract_strided_slice %5 {offsets = [56, 0], sizes = [8, 16], strides = [1, 1]} : vector<128x16xf32> to vector<8x16xf32>
    %38 = arith.addf %36, %37 : vector<8x16xf32>
    %c56 = arith.constant 56 : index
    %c0_25 = arith.constant 0 : index
    %39 = vector.load %arg10[%c56, %c0_25] : memref<128x16xf32, #tpu.memory_space<vmem>>, vector<8x16xf32>
    tpu.vector_store %arg10[%c56, %c0_25], %38 {strides = array<i32>} : memref<128x16xf32, #tpu.memory_space<vmem>>, vector<8x16xf32>,
    %cst_26 = arith.constant dense<0.000000e+00> : vector<8x16xf32>
    %40 = tpu.matmul %38, %6, %cst_26 {dimension_numbers = #tpu.dot_dimension_numbers<[1], [0], [0], [1], [0, 0, 1, 1], [], []>} : vector<8x16xf32>, vector<16x16xf32>, vector<8x16xf32> -> vector<8x16xf32>
    %41 = vector.extract_strided_slice %5 {offsets = [64, 0], sizes = [8, 16], strides = [1, 1]} : vector<128x16xf32> to vector<8x16xf32>
    %42 = arith.addf %40, %41 : vector<8x16xf32>
    %c64 = arith.constant 64 : index
    %c0_27 = arith.constant 0 : index
    %43 = vector.load %arg10[%c64, %c0_27] : memref<128x16xf32, #tpu.memory_space<vmem>>, vector<8x16xf32>
    tpu.vector_store %arg10[%c64, %c0_27], %42 {strides = array<i32>} : memref<128x16xf32, #tpu.memory_space<vmem>>, vector<8x16xf32>,
    %cst_28 = arith.constant dense<0.000000e+00> : vector<8x16xf32>
    %44 = tpu.matmul %42, %6, %cst_28 {dimension_numbers = #tpu.dot_dimension_numbers<[1], [0], [0], [1], [0, 0, 1, 1], [], []>} : vector<8x16xf32>, vector<16x16xf32>, vector<8x16xf32> -> vector<8x16xf32>
    %45 = vector.extract_strided_slice %5 {offsets = [72, 0], sizes = [8, 16], strides = [1, 1]} : vector<128x16xf32> to vector<8x16xf32>
    %46 = arith.addf %44, %45 : vector<8x16xf32>
    %c72 = arith.constant 72 : index
    %c0_29 = arith.constant 0 : index
    %47 = vector.load %arg10[%c72, %c0_29] : memref<128x16xf32, #tpu.memory_space<vmem>>, vector<8x16xf32>
    tpu.vector_store %arg10[%c72, %c0_29], %46 {strides = array<i32>} : memref<128x16xf32, #tpu.memory_space<vmem>>, vector<8x16xf32>,
    %cst_30 = arith.constant dense<0.000000e+00> : vector<8x16xf32>
    %48 = tpu.matmul %46, %6, %cst_30 {dimension_numbers = #tpu.dot_dimension_numbers<[1], [0], [0], [1], [0, 0, 1, 1], [], []>} : vector<8x16xf32>, vector<16x16xf32>, vector<8x16xf32> -> vector<8x16xf32>
    %49 = vector.extract_strided_slice %5 {offsets = [80, 0], sizes = [8, 16], strides = [1, 1]} : vector<128x16xf32> to vector<8x16xf32>
    %50 = arith.addf %48, %49 : vector<8x16xf32>
    %c80 = arith.constant 80 : index
    %c0_31 = arith.constant 0 : index
    %51 = vector.load %arg10[%c80, %c0_31] : memref<128x16xf32, #tpu.memory_space<vmem>>, vector<8x16xf32>
    tpu.vector_store %arg10[%c80, %c0_31], %50 {strides = array<i32>} : memref<128x16xf32, #tpu.memory_space<vmem>>, vector<8x16xf32>,
    %cst_32 = arith.constant dense<0.000000e+00> : vector<8x16xf32>
    %52 = tpu.matmul %50, %6, %cst_32 {dimension_numbers = #tpu.dot_dimension_numbers<[1], [0], [0], [1], [0, 0, 1, 1], [], []>} : vector<8x16xf32>, vector<16x16xf32>, vector<8x16xf32> -> vector<8x16xf32>
    %53 = vector.extract_strided_slice %5 {offsets = [88, 0], sizes = [8, 16], strides = [1, 1]} : vector<128x16xf32> to vector<8x16xf32>
    %54 = arith.addf %52, %53 : vector<8x16xf32>
    %c88 = arith.constant 88 : index
    %c0_33 = arith.constant 0 : index
    %55 = vector.load %arg10[%c88, %c0_33] : memref<128x16xf32, #tpu.memory_space<vmem>>, vector<8x16xf32>
    tpu.vector_store %arg10[%c88, %c0_33], %54 {strides = array<i32>} : memref<128x16xf32, #tpu.memory_space<vmem>>, vector<8x16xf32>,
    %cst_34 = arith.constant dense<0.000000e+00> : vector<8x16xf32>
    %56 = tpu.matmul %54, %6, %cst_34 {dimension_numbers = #tpu.dot_dimension_numbers<[1], [0], [0], [1], [0, 0, 1, 1], [], []>} : vector<8x16xf32>, vector<16x16xf32>, vector<8x16xf32> -> vector<8x16xf32>
    %57 = vector.extract_strided_slice %5 {offsets = [96, 0], sizes = [8, 16], strides = [1, 1]} : vector<128x16xf32> to vector<8x16xf32>
    %58 = arith.addf %56, %57 : vector<8x16xf32>
    %c96 = arith.constant 96 : index
    %c0_35 = arith.constant 0 : index
    %59 = vector.load %arg10[%c96, %c0_35] : memref<128x16xf32, #tpu.memory_space<vmem>>, vector<8x16xf32>
    tpu.vector_store %arg10[%c96, %c0_35], %58 {strides = array<i32>} : memref<128x16xf32, #tpu.memory_space<vmem>>, vector<8x16xf32>,
    %cst_36 = arith.constant dense<0.000000e+00> : vector<8x16xf32>
    %60 = tpu.matmul %58, %6, %cst_36 {dimension_numbers = #tpu.dot_dimension_numbers<[1], [0], [0], [1], [0, 0, 1, 1], [], []>} : vector<8x16xf32>, vector<16x16xf32>, vector<8x16xf32> -> vector<8x16xf32>
    %61 = vector.extract_strided_slice %5 {offsets = [104, 0], sizes = [8, 16], strides = [1, 1]} : vector<128x16xf32> to vector<8x16xf32>
    %62 = arith.addf %60, %61 : vector<8x16xf32>
    %c104 = arith.constant 104 : index
    %c0_37 = arith.constant 0 : index
    %63 = vector.load %arg10[%c104, %c0_37] : memref<128x16xf32, #tpu.memory_space<vmem>>, vector<8x16xf32>
    tpu.vector_store %arg10[%c104, %c0_37], %62 {strides = array<i32>} : memref<128x16xf32, #tpu.memory_space<vmem>>, vector<8x16xf32>,
    %cst_38 = arith.constant dense<0.000000e+00> : vector<8x16xf32>
    %64 = tpu.matmul %62, %6, %cst_38 {dimension_numbers = #tpu.dot_dimension_numbers<[1], [0], [0], [1], [0, 0, 1, 1], [], []>} : vector<8x16xf32>, vector<16x16xf32>, vector<8x16xf32> -> vector<8x16xf32>
    %65 = vector.extract_strided_slice %5 {offsets = [112, 0], sizes = [8, 16], strides = [1, 1]} : vector<128x16xf32> to vector<8x16xf32>
    %66 = arith.addf %64, %65 : vector<8x16xf32>
    %c112 = arith.constant 112 : index
    %c0_39 = arith.constant 0 : index
    %67 = vector.load %arg10[%c112, %c0_39] : memref<128x16xf32, #tpu.memory_space<vmem>>, vector<8x16xf32>
    tpu.vector_store %arg10[%c112, %c0_39], %66 {strides = array<i32>} : memref<128x16xf32, #tpu.memory_space<vmem>>, vector<8x16xf32>,
    %cst_40 = arith.constant dense<0.000000e+00> : vector<8x16xf32>
    %68 = tpu.matmul %66, %6, %cst_40 {dimension_numbers = #tpu.dot_dimension_numbers<[1], [0], [0], [1], [0, 0, 1, 1], [], []>} : vector<8x16xf32>, vector<16x16xf32>, vector<8x16xf32> -> vector<8x16xf32>
    %69 = vector.extract_strided_slice %5 {offsets = [120, 0], sizes = [8, 16], strides = [1, 1]} : vector<128x16xf32> to vector<8x16xf32>
    %70 = arith.addf %68, %69 : vector<8x16xf32>
    %c120 = arith.constant 120 : index
    %c0_41 = arith.constant 0 : index
    %71 = vector.load %arg10[%c120, %c0_41] : memref<128x16xf32, #tpu.memory_space<vmem>>, vector<8x16xf32>
    tpu.vector_store %arg10[%c120, %c0_41], %70 {strides = array<i32>} : memref<128x16xf32, #tpu.memory_space<vmem>>, vector<8x16xf32>,
    %c0_42 = arith.constant 0 : index
    %c0_43 = arith.constant 0 : index
    %72 = vector.load %arg10[%c0_42, %c0_43] : memref<128x16xf32, #tpu.memory_space<vmem>>, vector<128x16xf32>
    %c0_44 = arith.constant 0 : index
    %c0_45 = arith.constant 0 : index
    %73 = vector.load %arg1[%c0_44, %c0_45] : memref<128x16xf32, #tpu.memory_space<vmem>>, vector<128x16xf32>
    %c0_46 = arith.constant 0 : index
    %c0_47 = arith.constant 0 : index
    %74 = vector.load %arg6[%c0_46, %c0_47] : memref<16x2xf32, #tpu.memory_space<vmem>>, vector<16x2xf32>
    %cst_48 = arith.constant dense<0.000000e+00> : vector<128x2xf32>
    %75 = tpu.matmul %73, %74, %cst_48 {dimension_numbers = #tpu.dot_dimension_numbers<[1], [0], [0], [1], [0, 0, 1, 1], [], []>} : vector<128x16xf32>, vector<16x2xf32>, vector<128x2xf32> -> vector<128x2xf32>
    %c0_49 = arith.constant 0 : index
    %c0_50 = arith.constant 0 : index
    %76 = vector.load %arg7[%c0_49, %c0_50] : memref<16x2xf32, #tpu.memory_space<vmem>>, vector<16x2xf32>
    %cst_51 = arith.constant dense<0.000000e+00> : vector<128x2xf32>
    %77 = tpu.matmul %72, %76, %cst_51 {dimension_numbers = #tpu.dot_dimension_numbers<[1], [0], [0], [1], [0, 0, 1, 1], [], []>} : vector<128x16xf32>, vector<16x2xf32>, vector<128x2xf32> -> vector<128x2xf32>
    %78 = arith.addf %75, %77 : vector<128x2xf32>
    %c0_52 = arith.constant 0 : index
    %c0_53 = arith.constant 0 : index
    %79 = vector.load %arg8[%c0_52, %c0_53] : memref<1x2xf32, #tpu.memory_space<vmem>>, vector<1x2xf32>
    %80 = vector.broadcast %79 : vector<1x2xf32> to vector<128x2xf32>
    %81 = arith.addf %78, %80 : vector<128x2xf32>
    %cst_54 = arith.constant dense<0xFF800000> : vector<128xf32>
    %82 = vector.multi_reduction <maximumf>, %81, %cst_54 [1] : vector<128x2xf32> to vector<128xf32>
    %83 = vector.shape_cast %82 : vector<128xf32> to vector<128x1xf32>
    %84 = vector.broadcast %83 : vector<128x1xf32> to vector<128x2xf32>
    %85 = arith.subf %81, %84 : vector<128x2xf32>
    %86 = math.exp %85 : vector<128x2xf32>
    %cst_55 = arith.constant dense<0.000000e+00> : vector<128xf32>
    %87 = vector.multi_reduction <add>, %86, %cst_55 [1] : vector<128x2xf32> to vector<128xf32>
    %88 = vector.shape_cast %87 : vector<128xf32> to vector<128x1xf32>
    %89 = math.log %88 : vector<128x1xf32>
    %90 = arith.addf %83, %89 : vector<128x1xf32>
    %91 = vector.broadcast %90 : vector<128x1xf32> to vector<128x2xf32>
    %92 = arith.subf %81, %91 : vector<128x2xf32>
    %c0_56 = arith.constant 0 : index
    %c0_57 = arith.constant 0 : index
    %93 = vector.load %arg9[%c0_56, %c0_57] : memref<128x2xf32, #tpu.memory_space<vmem>>, vector<128x2xf32>
    tpu.vector_store %arg9[%c0_56, %c0_57], %92 {strides = array<i32>} : memref<128x2xf32, #tpu.memory_space<vmem>>, vector<128x2xf32>,
    return
  }
}

</mosaic_0001>

<bundles_post_ra>
// kernel: tpu_custom_call.1
= control target key start
LH: loop header
LB: loop body
LE: loop exit
PB: predicated region body
PF: predicated region fallthrough
CT: control target
= control target key end

     0   :  { %vm59_vm0 = vcmask 130048   ;;  %v2625_v3 = vmov 0.0|0.0   ;;  %vm2626_vm1 = vmmov 0   ;;  %v2627_v4 = vmov 0.0   ;;  %s3327_s3 = inlined_call_operand.vmem [shape: f32[16,16], index: 3, kind: input, shape index: {}]   ;;  %s3328_s0 = inlined_call_operand.vmem [shape: f32[128,16], index: 0, kind: input, shape index: {}]   ;;  %s3329_s4 = inlined_call_operand.vmem [shape: f32[16,16], index: 4, kind: input, shape index: {}]   ;;  %s3330_s2 = inlined_call_operand.vmem [shape: f32[8,16], index: 2, kind: input, shape index: {}]   ;;  %s3331_s5 = inlined_call_operand.vmem [shape: f32[1,16], index: 5, kind: input, shape index: {}]   ;;  %s3332_s10 = inlined_call_operand.vmem [shape: f32[128,16], index: 10, kind: output, shape index: {1}]   ;;  %s3333_s7 = inlined_call_operand.vmem [shape: f32[16,2], index: 7, kind: input, shape index: {}]   ;;  %s3334_s6 = inlined_call_operand.vmem [shape: f32[16,2], index: 6, kind: input, shape index: {}]   ;;  %s3335_s1 = inlined_call_operand.vmem [shape: f32[128,16], index: 1, kind: input, shape index: {}]   ;;  %s3336_s8 = inlined_call_operand.vmem [shape: f32[1,2], index: 8, kind: input, shape index: {}]   ;;  %s3337_s9 = inlined_call_operand.vmem [shape: f32[128,2], index: 9, kind: output, shape index: {0}]  }
   0x1   :  { %v50_v0 = vld [vmem:[%s3327_s3] sm:$0xff]  ;;  %v51_v1 = vld [vmem:[%s3327_s3 + $0x8] sm:$0xff]  ;;  %2510 = vmatprep.subr.bf16.mxu0 %v2625_v3  ;;  %2374 = vmatprep.mubr.msk.f32.mxu0 %vm2626_vm1, %v2627_v4  ;;  %v36_v10 = vld [vmem:[%s3328_s0 + $0x10] sm:$0xff]  ;;  %vm1885_vm2 = vcmask 15360  }
   0x2   :  { %v34_v2 = vld [vmem:[%s3328_s0] sm:$0xff]  ;;  %v2482_v5 = vpack.c.bf16 %v51_v1, %v50_v0  ;;  %v254_v7 = vld [vmem:[%s3329_s4 + $0x8] sm:$0xff]  ;;  %v37_v11 = vld [vmem:[%s3328_s0 + $0x18] sm:$0xff] }
   0x3   :  { %2290 = vmatprep.mubr.msk.f32.mxu1 %vm59_vm0, %v34_v2  ;;  %v253_v6 = vld [vmem:[%s3329_s4] sm:$0xff]  ;;  %v35_v9 = vld [vmem:[%s3328_s0 + $0x8] sm:$0xff]  ;;  %v40_v14 = vld [vmem:[%s3328_s0 + $0x30] sm:$0xff] }
   0x4   :  { %v2702_v8 = vpack.c.bf16 %v254_v7, %v253_v6  ;;  %2483 = vmatprep.subr.bf16.mxu1 %v2482_v5  ;;  %v38_v12 = vld [vmem:[%s3328_s0 + $0x20] sm:$0xff]  ;;  %v39_v13 = vld [vmem:[%s3328_s0 + $0x28] sm:$0xff]  ;;  %v41_v15 = vld [vmem:[%s3328_s0 + $0x38] sm:$0xff] }
   0x5   :  { %2485 = vmatpush3.bf16.msra.mxu1 %v2482_v5  ;;  %v42_v16 = vld [vmem:[%s3328_s0 + $0x40] sm:$0xff]  ;;  %v43_v17 = vld [vmem:[%s3328_s0 + $0x48] sm:$0xff]  ;;  %v44_v18 = vld [vmem:[%s3328_s0 + $0x50] sm:$0xff] }
   0x6   :  { %2512 = vmatpush3.bf16.msra.mxu0 %v2702_v8  ;;  %2486 = vmatprep.subr.bf16.mxu1 %v2625_v3  ;;  %v45_v19 = vld [vmem:[%s3328_s0 + $0x58] sm:$0xff]  ;;  %v46_v20 = vld [vmem:[%s3328_s0 + $0x60] sm:$0xff]  ;;  %v47_v21 = vld [vmem:[%s3328_s0 + $0x68] sm:$0xff] }
   0x7   :  { %2516 = vmatprep.subr.bf16.mxu0 %v2625_v3  ;;  %v48_v22 = vld [vmem:[%s3328_s0 + $0x70] sm:$0xff]  ;;  %v49_v23 = vld [vmem:[%s3328_s0 + $0x78] sm:$0xff]  ;;  %v255_v24 = vld [vmem:[%s3330_s2] sm:$0xff] }
   0x8   :  { %2291 = vmatmul.mubr.msk.f32.vlgmr.msra.gmra.mrb[0].mxu1 %vm59_vm0, %v35_v9  ;;  %v2118_v25 = vld [vmem:[%s3331_s5] ss:$0 sm:$0xff] }
   0x9   :  { %2488 = vmatpush3.bf16.msra.mxu1 %v2702_v8  ;;  %2293 = vmatprep.mubr.msk.f32.mxu1 %vm59_vm0, %v36_v10 }
   0xa   :  { %2489 = vmatprep.subr.bf16.mxu1 %v2625_v3 }
   0xc   :  { %2294 = vmatmul.mubr.msk.f32.gmra.mrb[2].mxu1 %vm59_vm0, %v37_v11 }
   0xd   :  { %2296 = vmatprep.mubr.msk.f32.mxu1 %vm59_vm0, %v38_v12 }
  0x10   :  { %2297 = vmatmul.mubr.msk.f32.gmra.mrb[4].mxu1 %vm59_vm0, %v39_v13 }
  0x11   :  { %2299 = vmatprep.mubr.msk.f32.mxu1 %vm59_vm0, %v40_v14 }
  0x14   :  { %2300 = vmatmul.mubr.msk.f32.gmra.mrb[6].mxu1 %vm59_vm0, %v41_v15 }
  0x15   :  { %2302 = vmatprep.mubr.msk.f32.mxu1 %vm59_vm0, %v42_v16 }
  0x18   :  { %2303 = vmatmul.mubr.msk.f32.gmra.mrb[8].mxu1 %vm59_vm0, %v43_v17 }
  0x19   :  { %2305 = vmatprep.mubr.msk.f32.mxu1 %vm59_vm0, %v44_v18 }
  0x1c   :  { %2306 = vmatmul.mubr.msk.f32.gmra.mrb[10].mxu1 %vm59_vm0, %v45_v19 }
  0x1d   :  { %2308 = vmatprep.mubr.msk.f32.mxu1 %vm59_vm0, %v46_v20 }
  0x20   :  { %2309 = vmatmul.mubr.msk.f32.gmra.mrb[12].mxu1 %vm59_vm0, %v47_v21 }
  0x21   :  { %2311 = vmatprep.mubr.msk.f32.mxu1 %vm59_vm0, %v48_v22 }
  0x24   :  { %2312 = vmatmul.mubr.msk.f32.gmra.mrb[14].mxu1 %vm59_vm0, %v49_v23 }
  0x25   :  { %2318 = vmatprep.mubr.msk.f32.mxu1 %vm2626_vm1, %v2627_v4 }
  0x28   :  { %2319 = vmatmul.mubr.msk.f32.vlgmr.msra.gmra.mrb[16].mxu1 %vm59_vm0, %v255_v24 }
  0x29   :  { %2491 = vmatpush3.bf16.msra.mxu1 %v2702_v8  ;;  %2325 = vmatprep.mubr.msk.f32.mxu1 %vm2626_vm1, %v2627_v4 }
  0x2a   :  { %2492 = vmatprep.subr.bf16.mxu1 %v2625_v3 }
  0xdb   :  { %v2292_v26 = vpop.f32.mrb[0].mxu1 }
  0xdc   :  { %v180_v27 = vadd.f32 %v2292_v26, %v2118_v25  ;;  %v174_v28 = vpop.f32.mrb[1].mxu1 }
  0xdd   :  { %v175_v57 = vadd.f32 %v2118_v25, %v174_v28 }
  0xdf   :  { %v2295_v29 = vpop.f32.mrb[2].mxu1 }
  0xe0   :  { %v190_v30 = vadd.f32 %v2295_v29, %v2118_v25  ;;  %v184_v31 = vpop.f32.mrb[3].mxu1 }
  0xe1   :  { %v185_v32 = vadd.f32 %v2118_v25, %v184_v31 }
  0xe3   :  { %v2298_v33 = vpop.f32.mrb[4].mxu1 }
  0xe4   :  { %v2782_v34 = vadd.f32 %v2298_v33, %v2118_v25  ;;  %v194_v35 = vpop.f32.mrb[5].mxu1 }
  0xe5   :  { %v195_v36 = vadd.f32 %v2118_v25, %v194_v35  ;;  %v1474_v35 = vld [vmem:[%s3333_s7] sm:$0xff] }
  0xe7   :  { %v2301_v37 = vpop.f32.mrb[6].mxu1 }
  0xe8   :  { %v2784_v38 = vadd.f32 %v2301_v37, %v2118_v25  ;;  %v204_v39 = vpop.f32.mrb[7].mxu1 }
  0xe9   :  { %v2786_v40 = vadd.f32 %v2118_v25, %v204_v39 }
  0xeb   :  { %v2304_v41 = vpop.f32.mrb[8].mxu1 }
  0xec   :  { %v2788_v42 = vadd.f32 %v2304_v41, %v2118_v25  ;;  %v214_v43 = vpop.f32.mrb[9].mxu1 }
  0xed   :  { %v2790_v44 = vadd.f32 %v2118_v25, %v214_v43 }
  0xef   :  { %v2307_v45 = vpop.f32.mrb[10].mxu1 }
  0xf0   :  { %v2792_v46 = vadd.f32 %v2307_v45, %v2118_v25  ;;  %v224_v47 = vpop.f32.mrb[11].mxu1 }
  0xf1   :  { %v2794_v48 = vadd.f32 %v2118_v25, %v224_v47 }
  0xf3   :  { %v2310_v49 = vpop.f32.mrb[12].mxu1 }
  0xf4   :  { %v2796_v50 = vadd.f32 %v2310_v49, %v2118_v25  ;;  %v234_v51 = vpop.f32.mrb[13].mxu1 }
  0xf5   :  { %v2798_v52 = vadd.f32 %v2118_v25, %v234_v51 }
  0xf7   :  { %v2313_v53 = vpop.f32.mrb[14].mxu1 }
  0xf8   :  { %v2800_v54 = vadd.f32 %v2313_v53, %v2118_v25  ;;  %v244_v55 = vpop.f32.mrb[15].mxu1  ;;  %v1472_v53 = vld [vmem:[%s3334_s6] sm:$0xff] }
  0xf9   :  { %v2802_v56 = vadd.f32 %v2118_v25, %v244_v55  ;;  %v1473_v55 = vld [vmem:[%s3334_s6 + $0x8] sm:$0xff] }
  0xfb   :  { %v325_v58 = vpop.f32.mrb[16].mxu1 }
  0xfc   :  { %v326_v59 = vadd.f32 %v325_v58, %v175_v57  ;;  %v2320_v60 = vpop.f32.mrb[17].mxu1  ;;  %v2538_v57 = vpack.c.bf16 %v1473_v55, %v1472_v53 }
  0xfe   :  { %329 = vst.msk [vmem:[%s3332_s10] sm:$0xff] %vm59_vm0, %v326_v59  ;;  %2326 = vmatmul.mubr.msk.f32.vlgmr.msra.gmra.mrb[18].mxu1 %vm59_vm0, %v326_v59 }
  0xff   :  { %2494 = vmatpush3.bf16.msra.mxu1 %v2702_v8  ;;  %2332 = vmatprep.mubr.msk.f32.mxu1 %vm2626_vm1, %v2627_v4 }
 0x100   :  { %2495 = vmatprep.subr.bf16.mxu1 %v2625_v3 }
 0x1d1   :  { %v399_v61 = vpop.f32.mrb[18].mxu1 }
 0x1d2   :  { %v400_v62 = vadd.f32 %v399_v61, %v180_v27  ;;  %v2327_v63 = vpop.f32.mrb[19].mxu1 }
 0x1d4   :  { %403 = vst.msk [vmem:[%s3332_s10 + $0x8] sm:$0xff] %vm59_vm0, %v400_v62  ;;  %2333 = vmatmul.mubr.msk.f32.vlgmr.msra.gmra.mrb[20].mxu1 %vm59_vm0, %v400_v62 }
 0x1d5   :  { %2497 = vmatpush3.bf16.msra.mxu1 %v2702_v8  ;;  %2339 = vmatprep.mubr.msk.f32.mxu1 %vm2626_vm1, %v2627_v4 }
 0x1d6   :  { %2498 = vmatprep.subr.bf16.mxu1 %v2625_v3 }
 0x2a7   :  { %v473_v0 = vpop.f32.mrb[20].mxu1 }
 0x2a8   :  { %v474_v1 = vadd.f32 %v473_v0, %v185_v32  ;;  %v2334_v2 = vpop.f32.mrb[21].mxu1 }
 0x2a9   :  { %v1458_v2 = vld [vmem:[%s3335_s1 + $0x10] sm:$0xff] }
 0x2aa   :  { %477 = vst.msk [vmem:[%s3332_s10 + $0x10] sm:$0xff] %vm59_vm0, %v474_v1  ;;  %2340 = vmatmul.mubr.msk.f32.vlgmr.msra.gmra.mrb[22].mxu1 %vm59_vm0, %v474_v1 }
 0x2ab   :  { %2500 = vmatpush3.bf16.msra.mxu1 %v2702_v8  ;;  %2346 = vmatprep.mubr.msk.f32.mxu1 %vm2626_vm1, %v2627_v4 }
 0x2ac   :  { %2501 = vmatprep.subr.bf16.mxu1 %v2625_v3 }
 0x2b1   :  { %v1442_v41 = vld [vmem:[%s3332_s10 + $0x10] sm:$0xff] }
 0x37d   :  { %v547_v5 = vpop.f32.mrb[22].mxu1 }
 0x37e   :  { %v548_v6 = vadd.f32 %v547_v5, %v190_v30  ;;  %v2341_v7 = vpop.f32.mrb[23].mxu1  ;;  %v1459_v5 = vld [vmem:[%s3335_s1 + $0x18] sm:$0xff] }
 0x37f   :  { %v1461_v7 = vld [vmem:[%s3335_s1 + $0x28] sm:$0xff] }
 0x380   :  { %551 = vst.msk [vmem:[%s3332_s10 + $0x18] sm:$0xff] %vm59_vm0, %v548_v6  ;;  %2347 = vmatmul.mubr.msk.f32.vlgmr.msra.gmra.mrb[24].mxu1 %vm59_vm0, %v548_v6  ;;  %v1460_v6 = vld [vmem:[%s3335_s1 + $0x20] sm:$0xff] }
 0x381   :  { %2503 = vmatpush3.bf16.msra.mxu1 %v2702_v8  ;;  %2353 = vmatprep.mubr.msk.f32.mxu1 %vm2626_vm1, %v2627_v4 }
 0x382   :  { %2504 = vmatprep.subr.bf16.mxu1 %v2625_v3 }
 0x453   :  { %v621_v9 = vpop.f32.mrb[24].mxu1 }
 0x454   :  { %v622_v10 = vadd.f32 %v621_v9, %v195_v36  ;;  %v2348_v11 = vpop.f32.mrb[25].mxu1  ;;  %v1475_v36 = vld [vmem:[%s3333_s7 + $0x8] sm:$0xff]  ;;  %v1462_v9 = vld [vmem:[%s3335_s1 + $0x30] sm:$0xff] }
 0x455   :  { %v2534_v37 = vpack.c.bf16 %v1475_v36, %v1474_v35  ;;  %v1464_v11 = vld [vmem:[%s3335_s1 + $0x40] sm:$0xff] }
 0x456   :  { %625 = vst.msk [vmem:[%s3332_s10 + $0x20] sm:$0xff] %vm59_vm0, %v622_v10  ;;  %2354 = vmatmul.mubr.msk.f32.vlgmr.msra.gmra.mrb[26].mxu1 %vm59_vm0, %v622_v10  ;;  %v1463_v10 = vld [vmem:[%s3335_s1 + $0x38] sm:$0xff] }
 0x457   :  { %2506 = vmatpush3.bf16.msra.mxu1 %v2702_v8  ;;  %2360 = vmatprep.mubr.msk.f32.mxu1 %vm2626_vm1, %v2627_v4 }
 0x458   :  { %2507 = vmatprep.subr.bf16.mxu1 %v2625_v3 }
 0x45d   :  { %v1444_v43 = vld [vmem:[%s3332_s10 + $0x20] sm:$0xff] }
 0x529   :  { %v695_v12 = vpop.f32.mrb[26].mxu1 }
 0x52a   :  { %v696_v13 = vadd.f32 %v695_v12, %v2782_v34  ;;  %v2355_v14 = vpop.f32.mrb[27].mxu1  ;;  %v1465_v12 = vld [vmem:[%s3335_s1 + $0x48] sm:$0xff] }
 0x52b   :  { %v1467_v14 = vld [vmem:[%s3335_s1 + $0x58] sm:$0xff] }
 0x52c   :  { %699 = vst.msk [vmem:[%s3332_s10 + $0x28] sm:$0xff] %vm59_vm0, %v696_v13  ;;  %2361 = vmatmul.mubr.msk.f32.vlgmr.msra.gmra.mrb[28].mxu1 %vm59_vm0, %v696_v13  ;;  %v1466_v13 = vld [vmem:[%s3335_s1 + $0x50] sm:$0xff] }
 0x52d   :  { %2509 = vmatpush3.bf16.msra.mxu1 %v2702_v8  ;;  %2367 = vmatprep.mubr.msk.f32.mxu1 %vm2626_vm1, %v2627_v4 }
 0x52e   :  { %2513 = vmatprep.subr.bf16.mxu1 %v2625_v3 }
 0x5ff   :  { %v769_v15 = vpop.f32.mrb[28].mxu1 }
 0x600   :  { %v770_v16 = vadd.f32 %v769_v15, %v2786_v40  ;;  %v2362_v17 = vpop.f32.mrb[29].mxu1  ;;  %v1468_v15 = vld [vmem:[%s3335_s1 + $0x60] sm:$0xff] }
 0x601   :  { %v1470_v17 = vld [vmem:[%s3335_s1 + $0x70] sm:$0xff] }
 0x602   :  { %773 = vst.msk [vmem:[%s3332_s10 + $0x30] sm:$0xff] %vm59_vm0, %v770_v16  ;;  %2368 = vmatmul.mubr.msk.f32.vlgmr.msra.gmra.mrb[30].mxu1 %vm59_vm0, %v770_v16  ;;  %v1469_v16 = vld [vmem:[%s3335_s1 + $0x68] sm:$0xff] }
 0x603   :  { %2515 = vmatpush3.bf16.msra.mxu1 %v2702_v8  ;;  %2381 = vmatprep.mubr.msk.f32.mxu1 %vm2626_vm1, %v2627_v4 }
 0x604   :  { %2519 = vmatprep.subr.bf16.mxu1 %v2625_v3 }
 0x609   :  { %v1446_v45 = vld [vmem:[%s3332_s10 + $0x30] sm:$0xff] }
 0x6d5   :  { %v843_v18 = vpop.f32.mrb[30].mxu1 }
 0x6d6   :  { %v844_v19 = vadd.f32 %v843_v18, %v2784_v38  ;;  %v2369_v20 = vpop.f32.mrb[31].mxu1  ;;  %v1471_v18 = vld [vmem:[%s3335_s1 + $0x78] sm:$0xff] }
 0x6d8   :  { %847 = vst.msk [vmem:[%s3332_s10 + $0x38] sm:$0xff] %vm59_vm0, %v844_v19  ;;  %2375 = vmatmul.mubr.msk.f32.vlgmr.msra.gmra.mrb[0].mxu0 %vm59_vm0, %v844_v19  ;;  %v2183_v19 = vld [vmem:[%s3336_s8] ss:$0 sm:$0xff] }
 0x6d9   :  { %2518 = vmatpush3.bf16.msra.mxu0 %v2702_v8  ;;  %2388 = vmatprep.mubr.msk.f32.mxu0 %vm2626_vm1, %v2627_v4 }
 0x6da   :  { %2522 = vmatprep.subr.bf16.mxu0 %v2625_v3 }
 0x7ab   :  { %v917_v21 = vpop.f32.mrb[0].mxu0 }
 0x7ac   :  { %v918_v22 = vadd.f32 %v917_v21, %v2790_v44  ;;  %v2376_v23 = vpop.f32.mrb[1].mxu0  ;;  %v1445_v44 = vld [vmem:[%s3332_s10 + $0x28] sm:$0xff] }
 0x7ae   :  { %921 = vst.msk [vmem:[%s3332_s10 + $0x40] sm:$0xff] %vm59_vm0, %v918_v22  ;;  %2382 = vmatmul.mubr.msk.f32.vlgmr.msra.gmra.mrb[32].mxu1 %vm59_vm0, %v918_v22 }
 0x7af   :  { %2521 = vmatpush3.bf16.msra.mxu1 %v2702_v8  ;;  %2395 = vmatprep.mubr.msk.f32.mxu1 %vm2626_vm1, %v2627_v4 }
 0x7b0   :  { %2525 = vmatprep.subr.bf16.mxu1 %v2625_v3 }
 0x7b5   :  { %v1448_v47 = vld [vmem:[%s3332_s10 + $0x40] sm:$0xff] }
 0x881   :  { %v991_v24 = vpop.f32.mrb[32].mxu1 }
 0x882   :  { %v992_v25 = vadd.f32 %v991_v24, %v2788_v42  ;;  %v2383_v26 = vpop.f32.mrb[33].mxu1  ;;  %v1443_v42 = vld [vmem:[%s3332_s10 + $0x18] sm:$0xff] }
 0x884   :  { %995 = vst.msk [vmem:[%s3332_s10 + $0x48] sm:$0xff] %vm59_vm0, %v992_v25  ;;  %2389 = vmatmul.mubr.msk.f32.vlgmr.msra.gmra.mrb[2].mxu0 %vm59_vm0, %v992_v25 }
 0x885   :  { %2524 = vmatpush3.bf16.msra.mxu0 %v2702_v8  ;;  %2402 = vmatprep.mubr.msk.f32.mxu0 %vm2626_vm1, %v2627_v4 }
 0x886   :  { %2528 = vmatprep.subr.bf16.mxu0 %v2625_v3 }
 0x957   :  { %v1065_v27 = vpop.f32.mrb[2].mxu0 }
 0x958   :  { %v1066_v28 = vadd.f32 %v1065_v27, %v2794_v48  ;;  %v2390_v29 = vpop.f32.mrb[3].mxu0  ;;  %v1449_v48 = vld [vmem:[%s3332_s10 + $0x48] sm:$0xff] }
 0x95a   :  { %1069 = vst.msk [vmem:[%s3332_s10 + $0x50] sm:$0xff] %vm59_vm0, %v1066_v28  ;;  %2396 = vmatmul.mubr.msk.f32.vlgmr.msra.gmra.mrb[34].mxu1 %vm59_vm0, %v1066_v28 }
 0x95b   :  { %2527 = vmatpush3.bf16.msra.mxu1 %v2702_v8  ;;  %2409 = vmatprep.mubr.msk.f32.mxu1 %vm2626_vm1, %v2627_v4 }
 0x95c   :  { %2531 = vmatprep.subr.bf16.mxu1 %v2625_v3 }
 0x961   :  { %v1450_v49 = vld [vmem:[%s3332_s10 + $0x50] sm:$0xff] }
 0xa2d   :  { %v1139_v30 = vpop.f32.mrb[34].mxu1 }
 0xa2e   :  { %v1140_v31 = vadd.f32 %v1139_v30, %v2792_v46  ;;  %v2397_v32 = vpop.f32.mrb[35].mxu1  ;;  %v1447_v46 = vld [vmem:[%s3332_s10 + $0x38] sm:$0xff] }
 0xa30   :  { %1143 = vst.msk [vmem:[%s3332_s10 + $0x58] sm:$0xff] %vm59_vm0, %v1140_v31  ;;  %2403 = vmatmul.mubr.msk.f32.vlgmr.msra.gmra.mrb[4].mxu0 %vm59_vm0, %v1140_v31 }
 0xa31   :  { %2530 = vmatpush3.bf16.msra.mxu0 %v2702_v8  ;;  %2416 = vmatprep.mubr.msk.f32.mxu0 %vm2626_vm1, %v2627_v4 }
 0xa32   :  { %2535 = vmatprep.subr.bf16.mxu0 %v2534_v37 }
 0xb03   :  { %v1213_v33 = vpop.f32.mrb[4].mxu0 }
 0xb04   :  { %v1214_v34 = vadd.f32 %v1213_v33, %v2798_v52  ;;  %v2404_v3 = vpop.f32.mrb[5].mxu0 }
 0xb06   :  { %1217 = vst.msk [vmem:[%s3332_s10 + $0x60] sm:$0xff] %vm59_vm0, %v1214_v34  ;;  %2410 = vmatmul.mubr.msk.f32.vlgmr.msra.gmra.mrb[36].mxu1 %vm59_vm0, %v1214_v34 }
 0xb07   :  { %2533 = vmatpush3.bf16.msra.mxu1 %v2702_v8  ;;  %2423 = vmatprep.mubr.msk.f32.mxu1 %vm2626_vm1, %v2627_v4  ;;  %v1440_v4 = vld [vmem:[%s3332_s10] sm:$0xff]  ;;  %v1441_v8 = vld [vmem:[%s3332_s10 + $0x8] sm:$0xff] }
 0xb0d   :  { %v1452_v51 = vld [vmem:[%s3332_s10 + $0x60] sm:$0xff] }
 0xbd9   :  { %v1287_v38 = vpop.f32.mrb[36].mxu1 }
 0xbda   :  { %v1288_v39 = vadd.f32 %v1287_v38, %v2796_v50  ;;  %v2411_v40 = vpop.f32.mrb[37].mxu1  ;;  %v1451_v50 = vld [vmem:[%s3332_s10 + $0x58] sm:$0xff] }
 0xbdc   :  { %1291 = vst.msk [vmem:[%s3332_s10 + $0x68] sm:$0xff] %vm59_vm0, %v1288_v39  ;;  %2417 = vmatmul.mubr.msk.f32.vlgmr.msra.gmra.mrb[6].mxu0 %vm59_vm0, %v1288_v39 }
 0xbdd   :  { %2537 = vmatpush3.bf16.msra.mxu0 %v2534_v37  ;;  %2430 = vmatprep.mubr.msk.f32.mxu0 %vm59_vm0, %v1440_v4 }
 0xbde   :  { %2539 = vmatprep.subr.bf16.mxu0 %v2538_v57 }
 0xbe0   :  { %2431 = vmatmul.mubr.msk.f32.vlgmr.msra.gmra.mrb[8].mxu0 %vm59_vm0, %v1441_v8 }
 0xbe1   :  { %2433 = vmatprep.mubr.msk.f32.mxu0 %vm59_vm0, %v1442_v41  ;;  %2541 = vmatpush3.bf16.msra.mxu0 %v2538_v57 }
 0xbe3   :  { %v1453_v52 = vld [vmem:[%s3332_s10 + $0x68] sm:$0xff] }
 0xbe4   :  { %2434 = vmatmul.mubr.msk.f32.gmra.mrb[10].mxu0 %vm59_vm0, %v1443_v42 }
 0xbe5   :  { %2436 = vmatprep.mubr.msk.f32.mxu0 %vm59_vm0, %v1444_v43 }
 0xbe8   :  { %2437 = vmatmul.mubr.msk.f32.gmra.mrb[12].mxu0 %vm59_vm0, %v1445_v44 }
 0xbe9   :  { %2439 = vmatprep.mubr.msk.f32.mxu0 %vm59_vm0, %v1446_v45 }
 0xbec   :  { %2440 = vmatmul.mubr.msk.f32.gmra.mrb[14].mxu0 %vm59_vm0, %v1447_v46 }
 0xbed   :  { %2442 = vmatprep.mubr.msk.f32.mxu0 %vm59_vm0, %v1448_v47 }
 0xbf0   :  { %2443 = vmatmul.mubr.msk.f32.gmra.mrb[16].mxu0 %vm59_vm0, %v1449_v48 }
 0xbf1   :  { %2445 = vmatprep.mubr.msk.f32.mxu0 %vm59_vm0, %v1450_v49 }
 0xbf4   :  { %2446 = vmatmul.mubr.msk.f32.gmra.mrb[18].mxu0 %vm59_vm0, %v1451_v50 }
 0xbf5   :  { %2448 = vmatprep.mubr.msk.f32.mxu0 %vm59_vm0, %v1452_v51 }
 0xbf8   :  { %2449 = vmatmul.mubr.msk.f32.gmra.mrb[20].mxu0 %vm59_vm0, %v1453_v52 }
 0xcaf   :  { %v1361_v58 = vpop.f32.mrb[6].mxu0 }
 0xcb0   :  { %v1362_v59 = vadd.f32 %v1361_v58, %v2802_v56  ;;  %v2418_v60 = vpop.f32.mrb[7].mxu0  ;;  %v1456_v56 = vld [vmem:[%s3335_s1] sm:$0xff] }
 0xcb2   :  { %1365 = vst.msk [vmem:[%s3332_s10 + $0x70] sm:$0xff] %vm59_vm0, %v1362_v59  ;;  %2424 = vmatmul.mubr.msk.f32.vlgmr.msra.gmra.mrb[38].mxu1 %vm59_vm0, %v1362_v59 }
 0xcb9   :  { %v1454_v61 = vld [vmem:[%s3332_s10 + $0x70] sm:$0xff] }
 0xcba   :  { %2451 = vmatprep.mubr.msk.f32.mxu0 %vm59_vm0, %v1454_v61 }
 0xd85   :  { %v1435_v62 = vpop.f32.mrb[38].mxu1 }
 0xd86   :  { %v1436_v63 = vadd.f32 %v1435_v62, %v2800_v54  ;;  %v2425_v0 = vpop.f32.mrb[39].mxu1  ;;  %v1457_v54 = vld [vmem:[%s3335_s1 + $0x8] sm:$0xff] }
 0xd88   :  { %1439 = vst.msk [vmem:[%s3332_s10 + $0x78] sm:$0xff] %vm59_vm0, %v1436_v63 }
 0xd8f   :  { %v1455_v1 = vld [vmem:[%s3332_s10 + $0x78] sm:$0xff] }
 0xd90   :  { %2452 = vmatmul.mubr.msk.f32.gmra.mrb[22].mxu0 %vm59_vm0, %v1455_v1 }
 0xd91   :  { %2458 = vmatprep.mubr.msk.f32.mxu0 %vm59_vm0, %v1456_v56 }
 0xd94   :  { %2459 = vmatmul.mubr.msk.f32.vlgmr.msra.gmra.mrb[8].mxu0 %vm59_vm0, %v1457_v54 }
 0xd95   :  { %2461 = vmatprep.mubr.msk.f32.mxu0 %vm59_vm0, %v1458_v2 }
 0xd98   :  { %2462 = vmatmul.mubr.msk.f32.gmra.mrb[10].mxu0 %vm59_vm0, %v1459_v5 }
 0xd99   :  { %2464 = vmatprep.mubr.msk.f32.mxu0 %vm59_vm0, %v1460_v6 }
 0xd9c   :  { %2465 = vmatmul.mubr.msk.f32.gmra.mrb[12].mxu0 %vm59_vm0, %v1461_v7 }
 0xd9d   :  { %2467 = vmatprep.mubr.msk.f32.mxu0 %vm59_vm0, %v1462_v9 }
 0xda0   :  { %2468 = vmatmul.mubr.msk.f32.gmra.mrb[14].mxu0 %vm59_vm0, %v1463_v10 }
 0xda1   :  { %2470 = vmatprep.mubr.msk.f32.mxu0 %vm59_vm0, %v1464_v11 }
 0xda4   :  { %2471 = vmatmul.mubr.msk.f32.gmra.mrb[16].mxu0 %vm59_vm0, %v1465_v12 }
 0xda5   :  { %2473 = vmatprep.mubr.msk.f32.mxu0 %vm59_vm0, %v1466_v13 }
 0xda8   :  { %2474 = vmatmul.mubr.msk.f32.gmra.mrb[18].mxu0 %vm59_vm0, %v1467_v14 }
 0xda9   :  { %2476 = vmatprep.mubr.msk.f32.mxu0 %vm59_vm0, %v1468_v15 }
 0xdac   :  { %2477 = vmatmul.mubr.msk.f32.gmra.mrb[20].mxu0 %vm59_vm0, %v1469_v16 }
 0xdad   :  { %2479 = vmatprep.mubr.msk.f32.mxu0 %vm59_vm0, %v1470_v17 }
 0xdb0   :  { %2480 = vmatmul.mubr.msk.f32.gmra.mrb[22].mxu0 %vm59_vm0, %v1471_v18 }
 0xe67   :  { %v2460_v20 = vpop.f32.mrb[8].mxu0 }
 0xe68   :  { %v3087_v21 = vadd.f32 %v2460_v20, %v2183_v19  ;;  %v1783_v22 = vpop.f32.mrb[9].mxu0 }
 0xe69   :  { %v3089_v23 = vadd.f32 %v2183_v19, %v1783_v22 }
 0xe6a   :  { %v1889_v24 = vsel %vm1885_vm2, %v3087_v21, -inf }
 0xe6b   :  { %1890 = vmax.xlane.f32.xlu0 %v1889_v24  ;;  %v2463_v25 = vpop.f32.mrb[10].mxu0  ;;  %v1886_v29 = vsel %vm1885_vm2, %v3089_v23, -inf }
 0xe6c   :  { %v3093_v26 = vadd.f32 %v2463_v25, %v2183_v19  ;;  %v1793_v27 = vpop.f32.mrb[11].mxu0 }
 0xe6d   :  { %v3095_v28 = vadd.f32 %v2183_v19, %v1793_v27 }
 0xe6e   :  { %v1895_v30 = vsel %vm1885_vm2, %v3093_v26, -inf }
 0xe6f   :  { %1887 = vmax.xlane.f32.xlu0 %v1886_v29  ;;  %1896 = vmax.xlane.f32.xlu1 %v1895_v30  ;;  %v2466_v31 = vpop.f32.mrb[12].mxu0  ;;  %v1892_v3 = vsel %vm1885_vm2, %v3095_v28, -inf }
 0xe70   :  { %v1803_v32 = vpop.f32.mrb[13].mxu0  ;;  %v3103_v34 = vadd.f32 %v2466_v31, %v2183_v19 }
 0xe71   :  { %v3101_v33 = vadd.f32 %v2183_v19, %v1803_v32 }
 0xe72   :  { %v1901_v40 = vsel %vm1885_vm2, %v3103_v34, -inf }
 0xe73   :  { %1893 = vmax.xlane.f32.xlu1 %v1892_v3  ;;  %v2469_v35 = vpop.f32.mrb[14].mxu0  ;;  %v1898_v36 = vsel %vm1885_vm2, %v3101_v33, -inf }
 0xe74   :  { %1899 = vmax.xlane.f32.xlu0 %v1898_v36  ;;  %v1813_v37 = vpop.f32.mrb[15].mxu0  ;;  %v3111_v39 = vadd.f32 %v2469_v35, %v2183_v19 }
 0xe75   :  { %v3109_v38 = vadd.f32 %v2183_v19, %v1813_v37 }
 0xe76   :  { %v1907_v44 = vsel %vm1885_vm2, %v3111_v39, -inf }
 0xe77   :  { %1902 = vmax.xlane.f32.xlu1 %v1901_v40  ;;  %v2472_v4 = vpop.f32.mrb[16].mxu0  ;;  %v1904_v8 = vsel %vm1885_vm2, %v3109_v38, -inf }
 0xe78   :  { %1905 = vmax.xlane.f32.xlu0 %v1904_v8  ;;  %v1823_v41 = vpop.f32.mrb[17].mxu0  ;;  %v3119_v43 = vadd.f32 %v2472_v4, %v2183_v19 }
 0xe79   :  { %v3117_v42 = vadd.f32 %v2183_v19, %v1823_v41 }
 0xe7a   :  { %v1913_v50 = vsel %vm1885_vm2, %v3119_v43, -inf }
 0xe7b   :  { %1908 = vmax.xlane.f32.xlu1 %v1907_v44  ;;  %v2475_v45 = vpop.f32.mrb[18].mxu0  ;;  %v1910_v46 = vsel %vm1885_vm2, %v3117_v42, -inf }
 0xe7c   :  { %1911 = vmax.xlane.f32.xlu0 %v1910_v46  ;;  %v1833_v47 = vpop.f32.mrb[19].mxu0  ;;  %v3127_v49 = vadd.f32 %v2475_v45, %v2183_v19 }
 0xe7d   :  { %v3125_v48 = vadd.f32 %v2183_v19, %v1833_v47 }
 0xe7e   :  { %v1919_v58 = vsel %vm1885_vm2, %v3127_v49, -inf }
 0xe7f   :  { %1914 = vmax.xlane.f32.xlu1 %v1913_v50  ;;  %v2478_v51 = vpop.f32.mrb[20].mxu0  ;;  %v1916_v52 = vsel %vm1885_vm2, %v3125_v48, -inf }
 0xe80   :  { %1917 = vmax.xlane.f32.xlu0 %v1916_v52  ;;  %v1843_v53 = vpop.f32.mrb[21].mxu0  ;;  %v3135_v57 = vadd.f32 %v2478_v51, %v2183_v19 }
 0xe81   :  { %v3133_v55 = vadd.f32 %v2183_v19, %v1843_v53 }
 0xe82   :  { %v1925_v0 = vsel %vm1885_vm2, %v3135_v57, -inf }
 0xe83   :  { %1920 = vmax.xlane.f32.xlu1 %v1919_v58  ;;  %v2481_v59 = vpop.f32.mrb[22].mxu0  ;;  %v1922_v60 = vsel %vm1885_vm2, %v3133_v55, -inf }
 0xe84   :  { %1923 = vmax.xlane.f32.xlu0 %v1922_v60  ;;  %v1853_v61 = vpop.f32.mrb[23].mxu0  ;;  %v3143_v63 = vadd.f32 %v2481_v59, %v2183_v19 }
 0xe85   :  { %v3141_v62 = vadd.f32 %v2183_v19, %v1853_v61 }
 0xe86   :  { %v1931_v1 = vsel %vm1885_vm2, %v3143_v63, -inf }
 0xe87   :  { %1926 = vmax.xlane.f32.xlu1 %v1925_v0  ;;  %v1928_v56 = vsel %vm1885_vm2, %v3141_v62, -inf }
 0xe88   :  { %1929 = vmax.xlane.f32.xlu0 %v1928_v56 }
 0xe8b   :  { %1932 = vmax.xlane.f32.xlu1 %v1931_v1 }
 0xef8   :  { %v3151_v54 = vpop.xlane.xlu0 %1890 }
 0xef9   :  { %v1935_v2 = vsub.f32 %v3087_v21, %v3151_v54 }
 0xefb   :  { %v1952_v5 = vmul.f32 1.442695, %v1935_v2 }
 0xefc   :  { %v3155_v6 = vpop.xlane.xlu0 %1887  ;;  %v3157_v7 = vpop.xlane.xlu1 %1896 }
 0xefd   :  { %2561 = vpow2.f32 %v1952_v5  ;;  %v1934_v9 = vsub.f32 %v3089_v23, %v3155_v6  ;;  %v1937_v10 = vsub.f32 %v3093_v26, %v3157_v7 }
 0xeff   :  { %v1950_v11 = vmul.f32 1.442695, %v1934_v9  ;;  %v1956_v12 = vmul.f32 1.442695, %v1937_v10 }
 0xf00   :  { %v3163_v13 = vpop.xlane.xlu1 %1893 }
 0xf01   :  { %2563 = vpow2.f32 %v1950_v11  ;;  %v1936_v14 = vsub.f32 %v3095_v28, %v3163_v13  ;;  %v3167_v15 = vpop.xlane.xlu0 %1899 }
 0xf02   :  { %2565 = vpow2.f32 %v1956_v12  ;;  %v1938_v16 = vsub.f32 %v3101_v33, %v3167_v15 }
 0xf03   :  { %v1954_v17 = vmul.f32 1.442695, %v1936_v14 }
 0xf04   :  { %v1958_v18 = vmul.f32 1.442695, %v1938_v16  ;;  %v3171_v19 = vpop.xlane.xlu1 %1902 }
 0xf05   :  { %2567 = vpow2.f32 %v1954_v17  ;;  %v1939_v20 = vsub.f32 %v3103_v34, %v3171_v19  ;;  %v3175_v22 = vpop.xlane.xlu0 %1905 }
 0xf06   :  { %v1940_v24 = vsub.f32 %v3109_v38, %v3175_v22  ;;  %2569 = vpow2.f32 %v1958_v18 }
 0xf07   :  { %v2562_v25 = vpop.eup %2561  ;;  %v1960_v27 = vmul.f32 1.442695, %v1939_v20 }
 0xf08   :  { %v1962_v29 = vmul.f32 1.442695, %v1940_v24  ;;  %v3179_v30 = vpop.xlane.xlu1 %1908  ;;  %v1985_v31 = vsel %vm1885_vm2, %v2562_v25, 0.0 }
 0xf09   :  { %2571 = vpow2.f32 %v1960_v27  ;;  %v1941_v32 = vsub.f32 %v3111_v39, %v3179_v30  ;;  %v3184_v3 = vpop.xlane.xlu0 %1911  ;;  %1986 = vadd.xlane.f32.xlu1 %v1985_v31 }
 0xf0a   :  { %v1942_v35 = vsub.f32 %v3117_v42, %v3184_v3  ;;  %2573 = vpow2.f32 %v1962_v29 }
 0xf0b   :  { %v2564_v36 = vpop.eup %2563  ;;  %v1964_v37 = vmul.f32 1.442695, %v1941_v32 }
 0xf0c   :  { %v2566_v40 = vpop.eup %2565  ;;  %v1966_v4 = vmul.f32 1.442695, %v1942_v35  ;;  %v3188_v8 = vpop.xlane.xlu1 %1914  ;;  %v1982_v41 = vsel %vm1885_vm2, %v2564_v36, 0.0 }
 0xf0d   :  { %2575 = vpow2.f32 %v1964_v37  ;;  %v1943_v44 = vsub.f32 %v3119_v43, %v3188_v8  ;;  %v3193_v45 = vpop.xlane.xlu0 %1917  ;;  %v1991_v46 = vsel %vm1885_vm2, %v2566_v40, 0.0  ;;  %1983 = vadd.xlane.f32.xlu0 %v1982_v41 }
 0xf0e   :  { %v1944_v47 = vsub.f32 %v3125_v48, %v3193_v45  ;;  %1992 = vadd.xlane.f32.xlu1 %v1991_v46  ;;  %2577 = vpow2.f32 %v1966_v4 }
 0xf0f   :  { %v2568_v50 = vpop.eup %2567  ;;  %v1968_v51 = vmul.f32 1.442695, %v1943_v44 }
 0xf10   :  { %v1970_v52 = vmul.f32 1.442695, %v1944_v47  ;;  %v3198_v53 = vpop.xlane.xlu1 %1920  ;;  %v1988_v58 = vsel %vm1885_vm2, %v2568_v50, 0.0  ;;  %v2570_v59 = vpop.eup %2569 }
 0xf11   :  { %2579 = vpow2.f32 %v1968_v51  ;;  %v1945_v60 = vsub.f32 %v3127_v49, %v3198_v53  ;;  %v3203_v61 = vpop.xlane.xlu0 %1923  ;;  %1989 = vadd.xlane.f32.xlu0 %v1988_v58  ;;  %v1994_v10 = vsel %vm1885_vm2, %v2570_v59, 0.0 }
 0xf12   :  { %v1946_v0 = vsub.f32 %v3133_v55, %v3203_v61  ;;  %2581 = vpow2.f32 %v1970_v52 }
 0xf13   :  { %v2572_v56 = vpop.eup %2571  ;;  %v1972_v1 = vmul.f32 1.442695, %v1945_v60 }
 0xf14   :  { %v1974_v2 = vmul.f32 1.442695, %v1946_v0  ;;  %v3207_v5 = vpop.xlane.xlu1 %1926  ;;  %v1997_v9 = vsel %vm1885_vm2, %v2572_v56, 0.0  ;;  %v2574_v11 = vpop.eup %2573 }
 0xf15   :  { %2583 = vpow2.f32 %v1972_v1  ;;  %v1947_v12 = vsub.f32 %v3135_v57, %v3207_v5  ;;  %1998 = vadd.xlane.f32.xlu1 %v1997_v9  ;;  %1995 = vadd.xlane.f32.xlu0 %v1994_v10  ;;  %v3213_v14 = vpop.xlane.xlu0 %1929  ;;  %v2000_v27 = vsel %vm1885_vm2, %v2574_v11, 0.0 }
 0xf16   :  { %v1948_v16 = vsub.f32 %v3141_v62, %v3213_v14  ;;  %2585 = vpow2.f32 %v1974_v2 }
 0xf17   :  { %v2576_v17 = vpop.eup %2575  ;;  %v1976_v18 = vmul.f32 1.442695, %v1947_v12 }
 0xf18   :  { %v1978_v20 = vmul.f32 1.442695, %v1948_v16  ;;  %v3217_v24 = vpop.xlane.xlu1 %1932  ;;  %v2003_v25 = vsel %vm1885_vm2, %v2576_v17, 0.0  ;;  %v2578_v29 = vpop.eup %2577 }
 0xf19   :  { %2587 = vpow2.f32 %v1976_v18  ;;  %v1949_v31 = vsub.f32 %v3143_v63, %v3217_v24  ;;  %2004 = vadd.xlane.f32.xlu1 %v2003_v25  ;;  %2001 = vadd.xlane.f32.xlu0 %v2000_v27  ;;  %v2006_v37 = vsel %vm1885_vm2, %v2578_v29, 0.0 }
 0xf1a   :  { %2589 = vpow2.f32 %v1978_v20 }
 0xf1b   :  { %v2580_v32 = vpop.eup %2579  ;;  %v1980_v35 = vmul.f32 1.442695, %v1949_v31 }
 0xf1c   :  { %v2009_v36 = vsel %vm1885_vm2, %v2580_v32, 0.0  ;;  %v2582_v40 = vpop.eup %2581 }
 0xf1d   :  { %2591 = vpow2.f32 %v1980_v35  ;;  %2010 = vadd.xlane.f32.xlu1 %v2009_v36  ;;  %2007 = vadd.xlane.f32.xlu0 %v2006_v37  ;;  %v2012_v44 = vsel %vm1885_vm2, %v2582_v40, 0.0 }
 0xf1f   :  { %v2584_v4 = vpop.eup %2583 }
 0xf20   :  { %v2015_v41 = vsel %vm1885_vm2, %v2584_v4, 0.0  ;;  %v2586_v46 = vpop.eup %2585 }
 0xf21   :  { %2016 = vadd.xlane.f32.xlu1 %v2015_v41  ;;  %2013 = vadd.xlane.f32.xlu0 %v2012_v44  ;;  %v2018_v51 = vsel %vm1885_vm2, %v2586_v46, 0.0 }
 0xf23   :  { %v2588_v47 = vpop.eup %2587 }
 0xf24   :  { %v2021_v50 = vsel %vm1885_vm2, %v2588_v47, 0.0  ;;  %v2590_v52 = vpop.eup %2589 }
 0xf25   :  { %2022 = vadd.xlane.f32.xlu1 %v2021_v50  ;;  %2019 = vadd.xlane.f32.xlu0 %v2018_v51  ;;  %v2024_v60 = vsel %vm1885_vm2, %v2590_v52, 0.0 }
 0xf27   :  { %v2592_v58 = vpop.eup %2591 }
 0xf28   :  { %v2027_v59 = vsel %vm1885_vm2, %v2592_v58, 0.0 }
 0xf29   :  { %2028 = vadd.xlane.f32.xlu1 %v2027_v59  ;;  %2025 = vadd.xlane.f32.xlu0 %v2024_v60 }
 0xf96   :  { %v1987_v0 = vpop.xlane.xlu1 %1986 }
 0xf97   :  { %2593 = vlog2.f32 %v1987_v0 }
 0xf9a   :  { %v1984_v56 = vpop.xlane.xlu0 %1983 }
 0xf9b   :  { %v1993_v1 = vpop.xlane.xlu1 %1992  ;;  %2595 = vlog2.f32 %v1984_v56 }
 0xf9c   :  { %2597 = vlog2.f32 %v1993_v1 }
 0xf9e   :  { %v1990_v2 = vpop.xlane.xlu0 %1989 }
 0xf9f   :  { %2599 = vlog2.f32 %v1990_v2 }
 0xfa1   :  { %v2594_v9 = vpop.eup %2593 }
 0xfa2   :  { %v2033_v10 = vmul.f32 0.6931472, %v2594_v9  ;;  %v1999_v11 = vpop.xlane.xlu1 %1998  ;;  %v1996_v12 = vpop.xlane.xlu0 %1995 }
 0xfa3   :  { %2601 = vlog2.f32 %v1999_v11 }
 0xfa4   :  { %v2063_v16 = vadd.f32 %v2033_v10, %v3151_v54  ;;  %2603 = vlog2.f32 %v1996_v12 }
 0xfa5   :  { %v2596_v17 = vpop.eup %2595 }
 0xfa6   :  { %v2598_v18 = vpop.eup %2597  ;;  %v2079_v20 = vsub.f32 %v3087_v21, %v2063_v16  ;;  %v2031_v25 = vmul.f32 0.6931472, %v2596_v17  ;;  %v2005_v27 = vpop.xlane.xlu1 %2004 }
 0xfa7   :  { %v2002_v29 = vpop.xlane.xlu0 %2001  ;;  %v2037_v31 = vmul.f32 0.6931472, %v2598_v18  ;;  %2605 = vlog2.f32 %v2005_v27 }
 0xfa8   :  { %2095 = vst.msk [vmem:[%s3337_s9 + $0x8] sm:$0xff] %vm1885_vm2, %v2079_v20  ;;  %v2062_v32 = vadd.f32 %v2031_v25, %v3155_v6  ;;  %2607 = vlog2.f32 %v2002_v29 }
 0xfa9   :  { %v2600_v35 = vpop.eup %2599  ;;  %v2065_v54 = vadd.f32 %v2037_v31, %v3157_v7 }
 0xfaa   :  { %v2078_v36 = vsub.f32 %v3089_v23, %v2062_v32  ;;  %v2035_v37 = vmul.f32 0.6931472, %v2600_v35  ;;  %v2011_v21 = vpop.xlane.xlu1 %2010 }
 0xfab   :  { %v2008_v40 = vpop.xlane.xlu0 %2007  ;;  %v2081_v4 = vsub.f32 %v3093_v26, %v2065_v54  ;;  %2609 = vlog2.f32 %v2011_v21 }
 0xfac   :  { %2094 = vst.msk [vmem:[%s3337_s9] sm:$0xff] %vm1885_vm2, %v2078_v36  ;;  %v2064_v41 = vadd.f32 %v2035_v37, %v3163_v13  ;;  %2611 = vlog2.f32 %v2008_v40 }
 0xfad   :  { %v2602_v6 = vpop.eup %2601  ;;  %2097 = vst.msk [vmem:[%s3337_s9 + $0x18] sm:$0xff] %vm1885_vm2, %v2081_v4 }
 0xfae   :  { %v2604_v23 = vpop.eup %2603  ;;  %v2080_v7 = vsub.f32 %v3095_v28, %v2064_v41  ;;  %v2041_v44 = vmul.f32 0.6931472, %v2602_v6  ;;  %v2017_v26 = vpop.xlane.xlu1 %2016 }
 0xfaf   :  { %v2014_v46 = vpop.xlane.xlu0 %2013  ;;  %v2039_v47 = vmul.f32 0.6931472, %v2604_v23  ;;  %2613 = vlog2.f32 %v2017_v26 }
 0xfb0   :  { %2096 = vst.msk [vmem:[%s3337_s9 + $0x10] sm:$0xff] %vm1885_vm2, %v2080_v7  ;;  %v2067_v13 = vadd.f32 %v2041_v44, %v3171_v19  ;;  %2615 = vlog2.f32 %v2014_v46 }
 0xfb1   :  { %v2606_v50 = vpop.eup %2605  ;;  %v2066_v51 = vadd.f32 %v2039_v47, %v3167_v15 }
 0xfb2   :  { %v2608_v52 = vpop.eup %2607  ;;  %v2083_v58 = vsub.f32 %v3103_v34, %v2067_v13  ;;  %v2045_v28 = vmul.f32 0.6931472, %v2606_v50  ;;  %v2023_v59 = vpop.xlane.xlu1 %2022 }
 0xfb3   :  { %v2020_v60 = vpop.xlane.xlu0 %2019  ;;  %v2082_v0 = vsub.f32 %v3101_v33, %v2066_v51  ;;  %v2043_v56 = vmul.f32 0.6931472, %v2608_v52  ;;  %2617 = vlog2.f32 %v2023_v59 }
 0xfb4   :  { %2099 = vst.msk [vmem:[%s3337_s9 + $0x28] sm:$0xff] %vm1885_vm2, %v2083_v58  ;;  %v2069_v19 = vadd.f32 %v2045_v28, %v3179_v30  ;;  %2619 = vlog2.f32 %v2020_v60 }
 0xfb5   :  { %v2610_v1 = vpop.eup %2609  ;;  %2098 = vst.msk [vmem:[%s3337_s9 + $0x20] sm:$0xff] %vm1885_vm2, %v2082_v0  ;;  %v2068_v34 = vadd.f32 %v2043_v56, %v3175_v22 }
 0xfb6   :  { %v2612_v15 = vpop.eup %2611  ;;  %v2085_v33 = vsub.f32 %v3111_v39, %v2069_v19  ;;  %v2049_v2 = vmul.f32 0.6931472, %v2610_v1  ;;  %v2029_v9 = vpop.xlane.xlu1 %2028 }
 0xfb7   :  { %v2026_v10 = vpop.xlane.xlu0 %2025  ;;  %v2084_v11 = vsub.f32 %v3109_v38, %v2068_v34  ;;  %v2047_v12 = vmul.f32 0.6931472, %v2612_v15  ;;  %2621 = vlog2.f32 %v2029_v9 }
 0xfb8   :  { %2101 = vst.msk [vmem:[%s3337_s9 + $0x38] sm:$0xff] %vm1885_vm2, %v2085_v33  ;;  %v2071_v30 = vadd.f32 %v2049_v2, %v3188_v8  ;;  %2623 = vlog2.f32 %v2026_v10 }
 0xfb9   :  { %v2614_v16 = vpop.eup %2613  ;;  %2100 = vst.msk [vmem:[%s3337_s9 + $0x30] sm:$0xff] %vm1885_vm2, %v2084_v11  ;;  %v2070_v39 = vadd.f32 %v2047_v12, %v3184_v3 }
 0xfba   :  { %v2616_v22 = vpop.eup %2615  ;;  %v2087_v38 = vsub.f32 %v3119_v43, %v2071_v30  ;;  %v2053_v17 = vmul.f32 0.6931472, %v2614_v16 }
 0xfbb   :  { %v2086_v18 = vsub.f32 %v3117_v42, %v2070_v39  ;;  %v2051_v20 = vmul.f32 0.6931472, %v2616_v22 }
 0xfbc   :  { %2103 = vst.msk [vmem:[%s3337_s9 + $0x48] sm:$0xff] %vm1885_vm2, %v2087_v38  ;;  %v2073_v8 = vadd.f32 %v2053_v17, %v3198_v53 }
 0xfbd   :  { %v2618_v25 = vpop.eup %2617  ;;  %2102 = vst.msk [vmem:[%s3337_s9 + $0x40] sm:$0xff] %vm1885_vm2, %v2086_v18  ;;  %v2072_v3 = vadd.f32 %v2051_v20, %v3193_v45 }
 0xfbe   :  { %v2620_v43 = vpop.eup %2619  ;;  %v2089_v27 = vsub.f32 %v3127_v49, %v2073_v8  ;;  %v2057_v42 = vmul.f32 0.6931472, %v2618_v25 }
 0xfbf   :  { %v2088_v29 = vsub.f32 %v3125_v48, %v2072_v3  ;;  %v2055_v31 = vmul.f32 0.6931472, %v2620_v43 }
 0xfc0   :  { %2105 = vst.msk [vmem:[%s3337_s9 + $0x58] sm:$0xff] %vm1885_vm2, %v2089_v27  ;;  %v2075_v53 = vadd.f32 %v2057_v42, %v3207_v5 }
 0xfc1   :  { %v2622_v32 = vpop.eup %2621  ;;  %2104 = vst.msk [vmem:[%s3337_s9 + $0x50] sm:$0xff] %vm1885_vm2, %v2088_v29  ;;  %v2074_v45 = vadd.f32 %v2055_v31, %v3203_v61 }
 0xfc2   :  { %v2624_v49 = vpop.eup %2623  ;;  %v2091_v35 = vsub.f32 %v3135_v57, %v2075_v53  ;;  %v2061_v48 = vmul.f32 0.6931472, %v2622_v32 }
 0xfc3   :  { %v2090_v54 = vsub.f32 %v3133_v55, %v2074_v45  ;;  %v2059_v36 = vmul.f32 0.6931472, %v2624_v49 }
 0xfc4   :  { %2107 = vst.msk [vmem:[%s3337_s9 + $0x68] sm:$0xff] %vm1885_vm2, %v2091_v35  ;;  %v2077_v5 = vadd.f32 %v2061_v48, %v3217_v24 }
 0xfc5   :  { %2106 = vst.msk [vmem:[%s3337_s9 + $0x60] sm:$0xff] %vm1885_vm2, %v2090_v54  ;;  %v2076_v61 = vadd.f32 %v2059_v36, %v3213_v14 }
 0xfc6   :  { %v2093_v57 = vsub.f32 %v3143_v63, %v2077_v5 }
 0xfc7   :  { %v2092_v37 = vsub.f32 %v3141_v62, %v2076_v61 }
 0xfc8   :  { %2109 = vst.msk [vmem:[%s3337_s9 + $0x78] sm:$0xff] %vm1885_vm2, %v2093_v57 }
 0xfc9   :  { %2108 = vst.msk [vmem:[%s3337_s9 + $0x70] sm:$0xff] %vm1885_vm2, %v2092_v37 }

</bundles_post_ra>
